<compile_context>
chip_gen: v7x
topology: tpu7x:2x2x1
jax: 0.10.0
libtpu: 0.0.40
codegen_flags: <defaults>
</compile_context>

<pallas_src>
import functools

import jax
import jax.numpy as jnp
from jax.experimental import pallas as pl
from jax.experimental.pallas import tpu as pltpu


# -----------------------------------------------------------------------------
# Kernel
# -----------------------------------------------------------------------------
def mlp_kernel(x_ref, w_in_ref, b_in_ref, w_h_ref, b_h_ref, w_out_ref,
               b_out_ref, o_ref, *, n_hidden_layers, n_input, n_output,
               tanh_dtype):
    # Feature-major tile layout (batch -> 128-wide lane axis):
    #   x_ref:     (N_INPUT, TB)
    #   w_in_ref:  (N_HIDDEN, N_INPUT)        (PyTorch (out, in) layout)
    #   b_in_ref:  (N_HIDDEN, 1)
    #   w_h_ref:   (L-1, N_HIDDEN, N_HIDDEN)  (each (out, in))
    #   b_h_ref:   (L-1, N_HIDDEN, 1)
    #   w_out_ref: (N_HIDDEN, 1)      if n_output == 1
    #              (N_OUTPUT, N_HIDDEN) otherwise (pre-transposed for the MXU)
    #   b_out_ref: (N_OUTPUT, 1)
    #   o_ref:     (N_OUTPUT, TB)     -- lane-dense output block

    def act(pre):
        if tanh_dtype == jnp.float32:
            return jnp.tanh(pre)
        # bf16 tanh (v6e/v7x EUP has a bf16 path); casts ride idle VALU slots.
        return jnp.tanh(pre.astype(tanh_dtype)).astype(jnp.float32)

    x = x_ref[...]                                       # (n_in, TB), f32

    # --- Layer 0: Linear(n_in, n_hidden) + tanh ------------------------------
    if n_input == 1:
        # K=1 matmul degenerates to an outer product: keep it on the VPU
        # instead of paying MXU fill/drain for zero useful systolic work.
        pre = w_in_ref[...] * x + b_in_ref[...]          # (nh,1)*(1,TB)+(nh,1)
    else:
        pre = (jnp.dot(w_in_ref[...], x,
                       preferred_element_type=jnp.float32,
                       precision=jax.lax.Precision.HIGHEST)
               + b_in_ref[...])
    h = act(pre)                                         # (n_hidden, TB)

    # --- Hidden layers: Linear(n_hidden, n_hidden) + tanh --------------------
    # Only a handful of layers -> static unroll keeps full LLO visibility.
    for l in range(n_hidden_layers):
        h = act(jnp.dot(w_h_ref[l], h,
                        preferred_element_type=jnp.float32,
                        precision=jax.lax.Precision.HIGHEST)
                + b_h_ref[l])

    # --- Output layer: Linear(n_hidden, n_out), no activation ----------------
    if n_output == 1:
        # N=1 matmul -> elementwise multiply + sublane reduce (VPU/XLU),
        # feeding the lane-dense (1, TB) output store directly.
        y = (jnp.sum(w_out_ref[...] * h, axis=0, keepdims=True)
             + b_out_ref[...])
    else:
        # w_out is pre-transposed to (n_out, n_hidden): plain MXU dot, no
        # in-kernel layout shuffle.
        y = (jnp.dot(w_out_ref[...], h,
                     preferred_element_type=jnp.float32,
                     precision=jax.lax.Precision.HIGHEST)
             + b_out_ref[...])
    o_ref[...] = y.astype(o_ref.dtype)


# -----------------------------------------------------------------------------
# Tile / grid shaping (chip-aware)
# -----------------------------------------------------------------------------
_TILE_CANDIDATES = (8192, 4096, 2048, 1024, 512, 256, 128)
_MAX_SINGLE_STEP_B = 8192


def _num_tensorcores():
    """Best-effort TensorCore-per-chip count (v7x: 2, v5e/v6e: 1)."""
    try:
        kind = jax.devices()[0].device_kind.lower()
    except Exception:
        return 1
    return 2 if "v7" in kind else 1


def _choose_tile_b(batch, num_tc):
    """Pick a lane-dense batch tile.

    Per-step VMEM footprint here is KBs, so the only levers are the ~0.35 us
    fixed per-grid-step overhead (fewer, bigger steps) and TensorCore load
    balance on multi-TC chips (>=2, ideally even, parallel steps).
    """
    if batch % 128 != 0 or batch <= 128:
        return batch                      # small / ragged batch: single step
    cands = [c for c in _TILE_CANDIDATES if batch % c == 0]
    if not cands:
        return batch
    if num_tc <= 1:
        # Single TC (v5e/v6e): extra grid steps are pure sequential overhead.
        if batch <= _MAX_SINGLE_STEP_B:
            return batch
        return cands[0]                   # largest candidate tile
    # Multi-TC (v7x): >=2 parallel steps, prefer an even step count so both
    # TensorCores get balanced work.
    for c in cands:
        steps = batch // c
        if steps >= 2 and steps % 2 == 0:
            return c
    for c in cands:
        if batch // c >= 2:
            return c
    return batch


# -----------------------------------------------------------------------------
# Wrapper
# -----------------------------------------------------------------------------
def bbnn_forward(x, params, *, tile_b=None, tanh_dtype=jnp.float32):
    """Pallas forward pass. x: (B, N_INPUT) float32 -> (B, N_OUTPUT)."""
    w_in, b_in, w_h, b_h, w_out, b_out = params
    B, n_in = x.shape
    n_hidden = w_in.shape[0]
    n_out = w_out.shape[0]                # w_out stored PyTorch-style (out, in)
    n_hidden_layers = w_h.shape[0]

    if tile_b is None:
        tile_b = _choose_tile_b(B, _num_tensorcores())
    assert B % tile_b == 0, "batch must be a multiple of tile_b"
    grid = (B // tile_b,)

    # Feature-major input (batch -> lanes). For n_in == 1 this is a free
    # reshape (no XLA transpose / HBM copy).
    x_t = x.reshape(1, B) if n_in == 1 else x.T

    # Output-layer weight in the layout the kernel wants:
    #   n_out == 1 -> (n_hidden, 1) column for the VPU reduce (free reshape)
    #   n_out  > 1 -> (n_out, n_hidden) for a plain MXU dot (no in-kernel T)
    w_out_k = w_out.reshape(n_hidden, 1) if n_out == 1 else w_out
    w_out_spec_shape = w_out_k.shape

    kernel = functools.partial(
        mlp_kernel,
        n_hidden_layers=n_hidden_layers,
        n_input=n_in,
        n_output=n_out,
        tanh_dtype=tanh_dtype,
    )

    y_t = pl.pallas_call(
        kernel,
        out_shape=jax.ShapeDtypeStruct((n_out, B), jnp.float32),
        grid_spec=pltpu.PrefetchScalarGridSpec(
            num_scalar_prefetch=0,
            grid=grid,
            in_specs=[
                # batch tile of the (feature-major) input
                pl.BlockSpec((n_in, tile_b), lambda i: (0, i)),
                # parameters: full arrays, same block every grid step
                pl.BlockSpec((n_hidden, n_in), lambda i: (0, 0)),
                pl.BlockSpec((n_hidden, 1), lambda i: (0, 0)),
                pl.BlockSpec((n_hidden_layers, n_hidden, n_hidden),
                             lambda i: (0, 0, 0)),
                pl.BlockSpec((n_hidden_layers, n_hidden, 1),
                             lambda i: (0, 0, 0)),
                pl.BlockSpec(w_out_spec_shape, lambda i: (0, 0)),
                pl.BlockSpec((n_out, 1), lambda i: (0, 0)),
            ],
            out_specs=pl.BlockSpec((n_out, tile_b), lambda i: (0, i)),
        ),
        compiler_params=pltpu.CompilerParams(
            dimension_semantics=("parallel",)),
    )(x_t, w_in, b_in, w_h, b_h, w_out_k, b_out)

    # Back to (B, n_out); free reshape for the n_out == 1 case.
    return y_t.reshape(B, n_out) if n_out == 1 else y_t.T


# -----------------------------------------------------------------------------
# Params / reference
# -----------------------------------------------------------------------------
def init_params(key, n_input, n_hidden, n_output, n_layers):
    """Deterministic init mimicking nn.Linear (uniform +-1/sqrt(fan_in)).

    All weights are stored in PyTorch (out, in) layout; biases are column
    vectors (out, 1).
    """
    keys = jax.random.split(key, 6)

    def uni(k, shape, fan_in):
        bound = 1.0 / jnp.sqrt(jnp.float32(fan_in))
        return jax.random.uniform(k, shape, jnp.float32, -bound, bound)

    w_in = uni(keys[0], (n_hidden, n_input), n_input)
    b_in = uni(keys[1], (n_hidden, 1), n_input)
    w_h = uni(keys[2], (n_layers - 1, n_hidden, n_hidden), n_hidden)
    b_h = uni(keys[3], (n_layers - 1, n_hidden, 1), n_hidden)
    w_out = uni(keys[4], (n_output, n_hidden), n_hidden)
    b_out = uni(keys[5], (n_output, 1), n_hidden)
    return (w_in, b_in, w_h, b_h, w_out, b_out)


def bbnn_forward_ref(x, params):
    """Pure-JAX batch-major reference (HIGHEST precision to match kernel)."""
    w_in, b_in, w_h, b_h, w_out, b_out = params
    hi = jax.lax.Precision.HIGHEST
    h = jnp.tanh(jnp.dot(x, w_in.T, precision=hi) + b_in.T)
    for l in range(w_h.shape[0]):
        h = jnp.tanh(jnp.dot(h, w_h[l].T, precision=hi) + b_h[l].T)
    return jnp.dot(h, w_out.T, precision=hi) + b_out.T


# -----------------------------------------------------------------------------
# Demo / correctness check
# -----------------------------------------------------------------------------
if __name__ == "__main__":
    # SDOF PINN: time scalar in, displacement scalar out.
    N_INPUT, N_OUTPUT, N_HIDDEN, N_LAYERS = 1, 1, 32, 4
    BATCH = 256   # v5e/v6e: 1 grid step (tile_b=256); v7x: 2 even parallel steps

    key = jax.random.PRNGKey(0)
    k_x, k_p = jax.random.split(key)
    x = jax.random.uniform(k_x, (BATCH, N_INPUT), jnp.float32, -1.0, 1.0)
    params = init_params(k_p, N_INPUT, N_HIDDEN, N_OUTPUT, N_LAYERS)

    y = bbnn_forward(x, params)          # tanh_dtype=jnp.bfloat16 opt-in on v6e/v7x
    y = jax.block_until_ready(y)

    y_ref = bbnn_forward_ref(x, params)
    assert y.shape == (BATCH, N_OUTPUT)
    assert jnp.allclose(y, y_ref, atol=1e-4, rtol=1e-4), "mismatch vs reference"

    print("KERNEL_OK")
</pallas_src>

<mosaic_0001>
module attributes {stable_mosaic.version = 11 : i64} {
  func.func @mlp_kernel(%arg0: i32, %arg1: memref<1x256xf32, #tpu.memory_space<vmem>>, %arg2: memref<32x1xf32, #tpu.memory_space<vmem>>, %arg3: memref<32x1xf32, #tpu.memory_space<vmem>>, %arg4: memref<3x32x32xf32, #tpu.memory_space<vmem>>, %arg5: memref<3x32x1xf32, #tpu.memory_space<vmem>>, %arg6: memref<32x1xf32, #tpu.memory_space<vmem>>, %arg7: memref<1x1xf32, #tpu.memory_space<vmem>>, %arg8: memref<1x256xf32, #tpu.memory_space<vmem>>) attributes {dimension_semantics = [#tpu.dimension_semantics<parallel>], iteration_bounds = array<i64: 1>, scalar_prefetch = 0 : i64, scratch_operands = 0 : i64, tpu.core_type = #tpu.core_type<tc>, window_params = [{transform_indices = @transform_0, window_bounds = array<i64: 1, 256>}, {pipeline_mode = #tpu.pipeline_mode<synchronous>, transform_indices = @transform_1, window_bounds = array<i64: 32, 1>}, {pipeline_mode = #tpu.pipeline_mode<synchronous>, transform_indices = @transform_2, window_bounds = array<i64: 32, 1>}, {pipeline_mode = #tpu.pipeline_mode<synchronous>, transform_indices = @transform_3, window_bounds = array<i64: 3, 32, 32>}, {pipeline_mode = #tpu.pipeline_mode<synchronous>, transform_indices = @transform_4, window_bounds = array<i64: 3, 32, 1>}, {pipeline_mode = #tpu.pipeline_mode<synchronous>, transform_indices = @transform_5, window_bounds = array<i64: 32, 1>}, {pipeline_mode = #tpu.pipeline_mode<synchronous>, transform_indices = @transform_6, window_bounds = array<i64: 1, 1>}, {transform_indices = @transform_7, window_bounds = array<i64: 1, 256>}]} {
    %c0 = arith.constant 0 : index
    %c0_0 = arith.constant 0 : index
    %0 = vector.load %arg1[%c0, %c0_0] : memref<1x256xf32, #tpu.memory_space<vmem>>, vector<1x256xf32>
    %c0_1 = arith.constant 0 : index
    %c0_2 = arith.constant 0 : index
    %1 = vector.load %arg2[%c0_1, %c0_2] : memref<32x1xf32, #tpu.memory_space<vmem>>, vector<32x1xf32>
    %2 = vector.broadcast %1 : vector<32x1xf32> to vector<32x256xf32>
    %3 = vector.broadcast %0 : vector<1x256xf32> to vector<32x256xf32>
    %4 = arith.mulf %2, %3 : vector<32x256xf32>
    %c0_3 = arith.constant 0 : index
    %c0_4 = arith.constant 0 : index
    %5 = vector.load %arg3[%c0_3, %c0_4] : memref<32x1xf32, #tpu.memory_space<vmem>>, vector<32x1xf32>
    %6 = vector.broadcast %5 : vector<32x1xf32> to vector<32x256xf32>
    %7 = arith.addf %4, %6 : vector<32x256xf32>
    %8 = math.tanh %7 : vector<32x256xf32>
    %c0_5 = arith.constant 0 : index
    %c0_6 = arith.constant 0 : index
    %c0_7 = arith.constant 0 : index
    %9 = vector.load %arg4[%c0_5, %c0_6, %c0_7] : memref<3x32x32xf32, #tpu.memory_space<vmem>>, vector<1x32x32xf32>
    %10 = vector.shape_cast %9 : vector<1x32x32xf32> to vector<32x32xf32>
    %cst = arith.constant dense<0.000000e+00> : vector<32x256xf32>
    %11 = tpu.matmul %10, %8, %cst {dimension_numbers = #tpu.dot_dimension_numbers<[1], [0], [0], [1], [0, 0, 1, 1], [], []>, precision = #tpu.contract_precision<fp32>} : vector<32x32xf32>, vector<32x256xf32>, vector<32x256xf32> -> vector<32x256xf32>
    %c0_8 = arith.constant 0 : index
    %c0_9 = arith.constant 0 : index
    %c0_10 = arith.constant 0 : index
    %12 = vector.load %arg5[%c0_8, %c0_9, %c0_10] : memref<3x32x1xf32, #tpu.memory_space<vmem>>, vector<1x32x1xf32>
    %13 = vector.shape_cast %12 : vector<1x32x1xf32> to vector<32x1xf32>
    %14 = vector.broadcast %13 : vector<32x1xf32> to vector<32x256xf32>
    %15 = arith.addf %11, %14 : vector<32x256xf32>
    %16 = math.tanh %15 : vector<32x256xf32>
    %c1 = arith.constant 1 : index
    %c0_11 = arith.constant 0 : index
    %c0_12 = arith.constant 0 : index
    %17 = vector.load %arg4[%c1, %c0_11, %c0_12] : memref<3x32x32xf32, #tpu.memory_space<vmem>>, vector<1x32x32xf32>
    %18 = vector.shape_cast %17 : vector<1x32x32xf32> to vector<32x32xf32>
    %cst_13 = arith.constant dense<0.000000e+00> : vector<32x256xf32>
    %19 = tpu.matmul %18, %16, %cst_13 {dimension_numbers = #tpu.dot_dimension_numbers<[1], [0], [0], [1], [0, 0, 1, 1], [], []>, precision = #tpu.contract_precision<fp32>} : vector<32x32xf32>, vector<32x256xf32>, vector<32x256xf32> -> vector<32x256xf32>
    %c1_14 = arith.constant 1 : index
    %c0_15 = arith.constant 0 : index
    %c0_16 = arith.constant 0 : index
    %20 = vector.load %arg5[%c1_14, %c0_15, %c0_16] : memref<3x32x1xf32, #tpu.memory_space<vmem>>, vector<1x32x1xf32>
    %21 = vector.shape_cast %20 : vector<1x32x1xf32> to vector<32x1xf32>
    %22 = vector.broadcast %21 : vector<32x1xf32> to vector<32x256xf32>
    %23 = arith.addf %19, %22 : vector<32x256xf32>
    %24 = math.tanh %23 : vector<32x256xf32>
    %c2 = arith.constant 2 : index
    %c0_17 = arith.constant 0 : index
    %c0_18 = arith.constant 0 : index
    %25 = vector.load %arg4[%c2, %c0_17, %c0_18] : memref<3x32x32xf32, #tpu.memory_space<vmem>>, vector<1x32x32xf32>
    %26 = vector.shape_cast %25 : vector<1x32x32xf32> to vector<32x32xf32>
    %cst_19 = arith.constant dense<0.000000e+00> : vector<32x256xf32>
    %27 = tpu.matmul %26, %24, %cst_19 {dimension_numbers = #tpu.dot_dimension_numbers<[1], [0], [0], [1], [0, 0, 1, 1], [], []>, precision = #tpu.contract_precision<fp32>} : vector<32x32xf32>, vector<32x256xf32>, vector<32x256xf32> -> vector<32x256xf32>
    %c2_20 = arith.constant 2 : index
    %c0_21 = arith.constant 0 : index
    %c0_22 = arith.constant 0 : index
    %28 = vector.load %arg5[%c2_20, %c0_21, %c0_22] : memref<3x32x1xf32, #tpu.memory_space<vmem>>, vector<1x32x1xf32>
    %29 = vector.shape_cast %28 : vector<1x32x1xf32> to vector<32x1xf32>
    %30 = vector.broadcast %29 : vector<32x1xf32> to vector<32x256xf32>
    %31 = arith.addf %27, %30 : vector<32x256xf32>
    %32 = math.tanh %31 : vector<32x256xf32>
    %c0_23 = arith.constant 0 : index
    %c0_24 = arith.constant 0 : index
    %33 = vector.load %arg6[%c0_23, %c0_24] : memref<32x1xf32, #tpu.memory_space<vmem>>, vector<32x1xf32>
    %34 = vector.broadcast %33 : vector<32x1xf32> to vector<32x256xf32>
    %35 = arith.mulf %34, %32 : vector<32x256xf32>
    %cst_25 = arith.constant dense<0.000000e+00> : vector<256xf32>
    %36 = vector.multi_reduction <add>, %35, %cst_25 [0] : vector<32x256xf32> to vector<256xf32>
    %37 = vector.shape_cast %36 : vector<256xf32> to vector<1x256xf32>
    %c0_26 = arith.constant 0 : index
    %c0_27 = arith.constant 0 : index
    %38 = vector.load %arg7[%c0_26, %c0_27] : memref<1x1xf32, #tpu.memory_space<vmem>>, vector<1x1xf32>
    %39 = vector.broadcast %38 : vector<1x1xf32> to vector<1x256xf32>
    %40 = arith.addf %37, %39 : vector<1x256xf32>
    %c0_28 = arith.constant 0 : index
    %c0_29 = arith.constant 0 : index
    %41 = vector.load %arg8[%c0_28, %c0_29] : memref<1x256xf32, #tpu.memory_space<vmem>>, vector<1x256xf32>
    tpu.vector_store %arg8[%c0_28, %c0_29], %40 {strides = array<i32>} : memref<1x256xf32, #tpu.memory_space<vmem>>, vector<1x256xf32>,
    return
  }
  func.func @transform_0(%arg0: i32) -> (i32, i32) {
    %c0_i32 = arith.constant 0 : i32
    %c0_i32_0 = arith.constant 0 : i32
    return %c0_i32, %arg0 : i32, i32
  }
  func.func @transform_1(%arg0: i32) -> (i32, i32) {
    %c0_i32 = arith.constant 0 : i32
    %c0_i32_0 = arith.constant 0 : i32
    %c0_i32_1 = arith.constant 0 : i32
    return %c0_i32, %c0_i32_0 : i32, i32
  }
  func.func @transform_2(%arg0: i32) -> (i32, i32) {
    %c0_i32 = arith.constant 0 : i32
    %c0_i32_0 = arith.constant 0 : i32
    %c0_i32_1 = arith.constant 0 : i32
    return %c0_i32, %c0_i32_0 : i32, i32
  }
  func.func @transform_3(%arg0: i32) -> (i32, i32, i32) {
    %c0_i32 = arith.constant 0 : i32
    %c0_i32_0 = arith.constant 0 : i32
    %c0_i32_1 = arith.constant 0 : i32
    %c0_i32_2 = arith.constant 0 : i32
    return %c0_i32, %c0_i32_0, %c0_i32_1 : i32, i32, i32
  }
  func.func @transform_4(%arg0: i32) -> (i32, i32, i32) {
    %c0_i32 = arith.constant 0 : i32
    %c0_i32_0 = arith.constant 0 : i32
    %c0_i32_1 = arith.constant 0 : i32
    %c0_i32_2 = arith.constant 0 : i32
    return %c0_i32, %c0_i32_0, %c0_i32_1 : i32, i32, i32
  }
  func.func @transform_5(%arg0: i32) -> (i32, i32) {
    %c0_i32 = arith.constant 0 : i32
    %c0_i32_0 = arith.constant 0 : i32
    %c0_i32_1 = arith.constant 0 : i32
    return %c0_i32, %c0_i32_0 : i32, i32
  }
  func.func @transform_6(%arg0: i32) -> (i32, i32) {
    %c0_i32 = arith.constant 0 : i32
    %c0_i32_0 = arith.constant 0 : i32
    %c0_i32_1 = arith.constant 0 : i32
    return %c0_i32, %c0_i32_0 : i32, i32
  }
  func.func @transform_7(%arg0: i32) -> (i32, i32) {
    %c0_i32 = arith.constant 0 : i32
    %c0_i32_0 = arith.constant 0 : i32
    return %c0_i32, %arg0 : i32, i32
  }
}

</mosaic_0001>

<bundles_post_ra>
// kernel: tpu_custom_call.1
= control target key start
LH: loop header
LB: loop body
LE: loop exit
PB: predicated region body
PF: predicated region fallthrough
CT: control target
= control target key end

     0   :  { %s3439_s0 = inlined_call_operand.vmem [shape: f32[1,256], index: 0, kind: input, shape index: {}]   ;;  %s3440_s1 = inlined_call_operand.vmem [shape: f32[32,1], index: 1, kind: input, shape index: {}]   ;;  %s3441_s2 = inlined_call_operand.vmem [shape: f32[32,1], index: 2, kind: input, shape index: {}]   ;;  %s3442_s3 = inlined_call_operand.vmem [shape: f32[3,32,32], index: 3, kind: input, shape index: {}]   ;;  %s3443_s4 = inlined_call_operand.vmem [shape: f32[3,32,1], index: 4, kind: input, shape index: {}]   ;;  %s3444_s5 = inlined_call_operand.vmem [shape: f32[32,1], index: 5, kind: input, shape index: {}]   ;;  %s3445_s6 = inlined_call_operand.<no memory space> [shape: f32[1,1], index: 6, kind: input, shape index: {}]   ;;  %s3446_s7 = inlined_call_operand.hbm [shape: f32[1,256], index: 7, kind: output, shape index: {}]  }
   0x1   :  { %v12_v0 = vstv %s3445_s6 }
   0x2   :  { %13 = vst [vmem:[#allocation2] sm:$0x1] %v12_v0 }
   0x3   :  { %v73_v1 = vld [vmem:[%s3441_s2] sm:$0xff]  ;;  %v2829_v3 = vmov 0   ;;  %v74_v4 = vld [vmem:[%s3441_s2 + $0x8] sm:$0xff]  ;;  %v33_v6 = vld [vmem:[%s3440_s1 + $0x18] sm:$0xff] }
   0x4   :  { %v30_v2 = vld [vmem:[%s3440_s1] sm:$0xff]  ;;  %2740 = vset.pattern.permute.xlu1 %v2829_v3  ;;  %2739 = vset.pattern.permute.xlu0 %v2829_v3  ;;  %v31_v5 = vld [vmem:[%s3440_s1 + $0x8] sm:$0xff]  ;;  %v32_v7 = vld [vmem:[%s3440_s1 + $0x10] sm:$0xff] }
   0x5   :  { %79 = vperm.xlu1 %2740, %v73_v1   ;;  %36 = vperm.xlu0 %2739, %v30_v2  }
   0x9   :  { %84 = vperm.xlu1 %2740, %v74_v4   ;;  %41 = vperm.xlu0 %2739, %v31_v5  }
   0xa   :  { %14 = vsyncpa [#allocation4], 0  ;;  %v76_v8 = vld [vmem:[%s3441_s2 + $0x18] sm:$0xff]  ;;  %v75_v9 = vld [vmem:[%s3441_s2 + $0x10] sm:$0xff]  ;;  %v2830_v22 = vmov 0.0   ;;  %v55_v28 = vlaneseq  ;;  %vm141_vm0 = vcmask 261120  }
   0xb   :  { %v118_v10 = vld [vmem:[%s3443_s4 + $0x8] sm:$0xff]  ;;  %v117_v11 = vld [vmem:[%s3443_s4] sm:$0xff]  ;;  %v120_v12 = vld [vmem:[%s3443_s4 + $0x18] sm:$0xff]  ;;  %226 = vmatprep.mubr.f32.mxu1 %v2830_v22  ;;  %589 = vmatprep.mubr.f32.mxu0 %v2830_v22 }
   0xc   :  { %v119_v13 = vld [vmem:[%s3443_s4 + $0x10] sm:$0xff]  ;;  %v2436_v14 = vld [vmem:[%s3443_s4 + $0x28] sm:$0xff]  ;;  %v2435_v15 = vld [vmem:[%s3443_s4 + $0x20] sm:$0xff]  ;;  %v2951_v29 = vshrl.u32 %v55_v28, 7  ;;  %vm2414_vm1 = vcmp.lt.s32.totalorder %v55_v28, 256 }
   0xd   :  { %51 = vperm.xlu1 %2740, %v33_v6   ;;  %46 = vperm.xlu0 %2739, %v32_v7   ;;  %v2438_v16 = vld [vmem:[%s3443_s4 + $0x38] sm:$0xff]  ;;  %v2437_v17 = vld [vmem:[%s3443_s4 + $0x30] sm:$0xff]  ;;  %v2444_v18 = vld [vmem:[%s3443_s4 + $0x48] sm:$0xff] }
   0xe   :  { %v2443_v19 = vld [vmem:[%s3443_s4 + $0x40] sm:$0xff]  ;;  %v2446_v20 = vld [vmem:[%s3443_s4 + $0x58] sm:$0xff]  ;;  %v2445_v21 = vld [vmem:[%s3443_s4 + $0x50] sm:$0xff]  ;;  %v57_v30 = vsub.s32 0, %v2951_v29  ;;  %v61_v31 = vsub.s32 1, %v2951_v29 }
   0xf   :  { %v2333_v23 = vld [vmem:[%s3444_s5 + $0x8] sm:$0xff]  ;;  %v2332_v24 = vld [vmem:[%s3444_s5] sm:$0xff]  ;;  %v2335_v25 = vld [vmem:[%s3444_s5 + $0x18] sm:$0xff] }
  0x10   :  { %v2334_v26 = vld [vmem:[%s3444_s5 + $0x10] sm:$0xff]  ;;  %v2382_v27 = vld [vmem:[#allocation2] sm:$0x1]  ;;  %v114_v51 = vld [vmem:[%s3442_s3 + $0x8] sm:$0xff] }
  0x11   :  { %94 = vperm.xlu1 %2740, %v76_v8   ;;  %89 = vperm.xlu0 %2739, %v75_v9   ;;  %v29_v32 = vld [vmem:[%s3439_s0] sm:$0x3]  ;;  %v146_v59 = vsel %vm141_vm0, %v114_v51, 0  ;;  %v115_v5 = vld [vmem:[%s3442_s3 + $0x10] sm:$0xff] }
  0x12   :  { %v58_v33 = vrot.slane %v29_v32, %v57_v30  ;;  %v62_v34 = vrot.slane %v29_v32, %v61_v31  ;;  %v113_v43 = vld [vmem:[%s3442_s3] sm:$0xff]  ;;  %v2973_v2 = vand.u32 4294901760, %v146_v59 }
  0x13   :  { %v143_v48 = vsel %vm141_vm0, %v113_v43, 0 }
  0x14   :  { %v2967_v52 = vand.u32 4294901760, %v143_v48 }
  0x15   :  { %128 = vperm.xlu1 %2740, %v118_v10   ;;  %123 = vperm.xlu0 %2739, %v117_v11   ;;  %v2982_v10 = vsub.f32 %v146_v59, %v2973_v2 }
  0x16   :  { %v2971_v0 = vsub.f32 %v143_v48, %v2967_v52 }
  0x18   :  { %v229_v7 = vand.u32 4294901760, %v2971_v0 }
  0x19   :  { %138 = vperm.xlu1 %2740, %v120_v12   ;;  %133 = vperm.xlu0 %2739, %v119_v13   ;;  %v149_v13 = vsel %vm141_vm0, %v115_v5, 0 }
  0x1d   :  { %869 = vperm.xlu1 %2740, %v2436_v14   ;;  %864 = vperm.xlu0 %2739, %v2435_v15  }
  0x21   :  { %879 = vperm.xlu1 %2740, %v2438_v16   ;;  %874 = vperm.xlu0 %2739, %v2437_v17  }
  0x25   :  { %1609 = vperm.xlu1 %2740, %v2444_v18   ;;  %1604 = vperm.xlu0 %2739, %v2443_v19   ;;  %v2995_v19 = vsub.f32 %v2971_v0, %v229_v7 }
  0x29   :  { %1619 = vperm.xlu1 %2740, %v2446_v20   ;;  %1614 = vperm.xlu0 %2739, %v2445_v21   ;;  %v116_v20 = vld [vmem:[%s3442_s3 + $0x18] sm:$0xff] }
  0x2d   :  { %2343 = vperm.xlu1 %2740, %v2333_v23   ;;  %2338 = vperm.xlu0 %2739, %v2332_v24   ;;  %v240_v24 = vand.u32 4294901760, %v2982_v10 }
  0x31   :  { %2353 = vperm.xlu1 %2740, %v2335_v25   ;;  %2348 = vperm.xlu0 %2739, %v2334_v26   ;;  %v3005_v25 = vand.u32 4294901760, %v149_v13 }
  0x35   :  { %2385 = vperm.xlu0 %2739, %v2382_v27  }
  0x84   :  { %v80_v35 = vpop.permute.xlu1 %79  ;;  %v37_v36 = vpop.permute.xlu0 %36 }
  0x85   :  { %v65_v37 = vmul.f32 %v58_v33, %v37_v36  ;;  %v66_v38 = vmul.f32 %v62_v34, %v37_v36  ;;  %v231_v36 = vand.u32 4294901760, %v2995_v19 }
  0x87   :  { %v97_v39 = vadd.f32 %v80_v35, %v65_v37  ;;  %v98_v40 = vadd.f32 %v80_v35, %v66_v38 }
  0x88   :  { %v85_v41 = vpop.permute.xlu1 %84  ;;  %v42_v42 = vpop.permute.xlu0 %41 }
  0x89   :  { %2741 = vtanh.f32 %v97_v39  ;;  %v67_v44 = vmul.f32 %v58_v33, %v42_v42  ;;  %v68_v45 = vmul.f32 %v62_v34, %v42_v42  ;;  %v3022_v42 = vsub.f32 %v149_v13, %v3005_v25 }
  0x8a   :  { %2743 = vtanh.f32 %v98_v40 }
  0x8b   :  { %v99_v46 = vadd.f32 %v85_v41, %v67_v44  ;;  %v100_v47 = vadd.f32 %v85_v41, %v68_v45  ;;  %v241_v41 = vsub.f32 %v2982_v10, %v240_v24 }
  0x8c   :  { %v52_v49 = vpop.permute.xlu1 %51  ;;  %v47_v50 = vpop.permute.xlu0 %46 }
  0x8d   :  { %2745 = vtanh.f32 %v99_v46  ;;  %v71_v53 = vmul.f32 %v58_v33, %v52_v49  ;;  %v72_v54 = vmul.f32 %v62_v34, %v52_v49  ;;  %v69_v55 = vmul.f32 %v58_v33, %v47_v50 }
  0x8e   :  { %2747 = vtanh.f32 %v100_v47  ;;  %v70_v56 = vmul.f32 %v62_v34, %v47_v50  ;;  %v152_v33 = vsel %vm141_vm0, %v116_v20, 0  ;;  %v242_v20 = vand.u32 4294901760, %v241_v41 }
  0x8f   :  { %v3027_v47 = vand.u32 4294901760, %v152_v33 }
  0x90   :  { %v95_v57 = vpop.permute.xlu1 %94  ;;  %v90_v58 = vpop.permute.xlu0 %89 }
  0x91   :  { %v103_v60 = vadd.f32 %v95_v57, %v71_v53  ;;  %v104_v61 = vadd.f32 %v95_v57, %v72_v54  ;;  %v101_v62 = vadd.f32 %v90_v58, %v69_v55  ;;  %v102_v63 = vadd.f32 %v90_v58, %v70_v56 }
  0x93   :  { %v2742_v1 = vpop.eup %2741  ;;  %2749 = vtanh.f32 %v103_v60 }
  0x94   :  { %v2744_v3 = vpop.eup %2743  ;;  %2751 = vtanh.f32 %v104_v61  ;;  %v156_v6 = vand.u32 4294901760, %v2742_v1 }
  0x95   :  { %2753 = vtanh.f32 %v101_v62  ;;  %v154_v4 = vand.u32 4294901760, %v2744_v3 }
  0x96   :  { %2755 = vtanh.f32 %v102_v63  ;;  %v2988_v17 = vsub.f32 %v2742_v1, %v156_v6  ;;  %v251_v1 = vand.u32 4294901760, %v3022_v42 }
  0x97   :  { %v2746_v8 = vpop.eup %2745  ;;  %v2979_v9 = vsub.f32 %v2744_v3, %v154_v4 }
  0x98   :  { %v2748_v11 = vpop.eup %2747  ;;  %v160_v12 = vand.u32 4294901760, %v2746_v8  ;;  %v279_v37 = vand.u32 4294901760, %v2988_v17 }
  0x99   :  { %v158_v14 = vand.u32 4294901760, %v2748_v11  ;;  %v273_v15 = vand.u32 4294901760, %v2979_v9 }
  0x9a   :  { %v2986_v16 = vpack.c.bf16 %v160_v12, %v156_v6  ;;  %v2990_v18 = vsub.f32 %v2746_v8, %v160_v12  ;;  %v280_v55 = vsub.f32 %v2988_v17, %v279_v37  ;;  %v3050_v6 = vsub.f32 %v152_v33, %v3027_v47 }
  0x9b   :  { %v3000_v21 = vpack.c.bf16 %v158_v14, %v154_v4  ;;  %v3002_v23 = vsub.f32 %v2748_v11, %v158_v14  ;;  %v274_v31 = vsub.f32 %v2979_v9, %v273_v15  ;;  %v252_v33 = vsub.f32 %v3022_v42, %v251_v1 }
  0x9c   :  { %v291_v26 = vand.u32 4294901760, %v2990_v18  ;;  %v281_v8 = vand.u32 4294901760, %v280_v55 }
  0x9d   :  { %v2750_v27 = vpop.eup %2749  ;;  %2448 = vmatprep.subr.bf16.mxu1 %v3000_v21  ;;  %2472 = vmatprep.subr.bf16.mxu0 %v3000_v21  ;;  %v285_v32 = vand.u32 4294901760, %v3002_v23  ;;  %v275_v50 = vand.u32 4294901760, %v274_v31 }
  0x9e   :  { %v2752_v34 = vpop.eup %2751  ;;  %2450 = vmatpush1.bf16.msra.mxu1 %v2986_v16  ;;  %2474 = vmatpush1.bf16.msra.mxu0 %v2986_v16  ;;  %v168_v35 = vand.u32 4294901760, %v2750_v27  ;;  %v292_v46 = vsub.f32 %v2990_v18, %v291_v26  ;;  %v2481_v19 = vpack.c.bf16 %v291_v26, %v279_v37 }
  0x9f   :  { %v2754_v38 = vpop.eup %2753  ;;  %v166_v39 = vand.u32 4294901760, %v2752_v34  ;;  %v286_v40 = vsub.f32 %v3002_v23, %v285_v32  ;;  %v2479_v3 = vpack.c.bf16 %v285_v32, %v273_v15 }
  0xa0   :  { %v2756_v43 = vpop.eup %2755  ;;  %v164_v44 = vand.u32 4294901760, %v2754_v38  ;;  %v3024_v45 = vsub.f32 %v2750_v27, %v168_v35  ;;  %v293_v61 = vand.u32 4294901760, %v292_v46 }
  0xa1   :  { %v162_v48 = vand.u32 4294901760, %v2756_v43  ;;  %v3029_v49 = vsub.f32 %v2752_v34, %v166_v39  ;;  %v287_v51 = vand.u32 4294901760, %v286_v40  ;;  %v262_v34 = vand.u32 4294901760, %v3050_v6 }
  0xa2   :  { %v3031_v53 = vpack.c.bf16 %v168_v35, %v164_v44  ;;  %v3033_v54 = vsub.f32 %v2754_v38, %v164_v44  ;;  %v315_v56 = vand.u32 4294901760, %v3024_v45  ;;  %v2457_v15 = vpack.c.bf16 %v293_v61, %v281_v8 }
  0xa3   :  { %v3037_v57 = vpack.c.bf16 %v166_v39, %v162_v48  ;;  %v3039_v58 = vsub.f32 %v2756_v43, %v162_v48  ;;  %v2455_v59 = vpack.c.bf16 %v287_v51, %v275_v50  ;;  %v309_v60 = vand.u32 4294901760, %v3029_v49 }
  0xa4   :  { %v303_v62 = vand.u32 4294901760, %v3033_v54  ;;  %v316_v63 = vsub.f32 %v3024_v45, %v315_v56  ;;  %v263_v37 = vsub.f32 %v3050_v6, %v262_v34 }
  0xa5   :  { %2452 = vmatprep.subr.bf16.mxu1 %v3037_v57  ;;  %2476 = vmatprep.subr.bf16.mxu0 %v3037_v57  ;;  %v297_v4 = vand.u32 4294901760, %v3039_v58  ;;  %v310_v5 = vsub.f32 %v3029_v49, %v309_v60 }
  0xa6   :  { %2454 = vmatpush1.bf16.msra.mxu1 %v3031_v53  ;;  %2478 = vmatpush1.bf16.msra.mxu0 %v3031_v53  ;;  %v304_v11 = vsub.f32 %v3033_v54, %v303_v62  ;;  %v317_v12 = vand.u32 4294901760, %v316_v63  ;;  %v2485_v26 = vpack.c.bf16 %v315_v56, %v303_v62  ;;  %v264_v39 = vand.u32 4294901760, %v263_v37 }
  0xa7   :  { %2456 = vmatprep.subr.bf16.mxu1 %v2455_v59  ;;  %2480 = vmatprep.subr.bf16.mxu0 %v2479_v3  ;;  %v298_v13 = vsub.f32 %v3039_v58, %v297_v4  ;;  %v311_v14 = vand.u32 4294901760, %v310_v5  ;;  %v2483_v31 = vpack.c.bf16 %v309_v60, %v297_v4 }
  0xa8   :  { %v305_v27 = vand.u32 4294901760, %v304_v11 }
  0xa9   :  { %232 = vmatmul.mubr.f32.vlgmr.msra.gmra.mrb[0].mxu1 %v231_v36  ;;  %593 = vmatmul.mubr.f32.vlgmr.msra.gmra.mrb[0].mxu0 %v229_v7  ;;  %v299_v32 = vand.u32 4294901760, %v298_v13  ;;  %v2463_v7 = vpack.c.bf16 %v3002_v23, %v2979_v9  ;;  %v253_v36 = vand.u32 4294901760, %v252_v33  ;;  %v2465_v9 = vpack.c.bf16 %v2990_v18, %v2988_v17 }
  0xaa   :  { %2458 = vmatpush1.bf16.msra.mxu1 %v2457_v15  ;;  %2482 = vmatpush1.bf16.msra.mxu0 %v2481_v19  ;;  %v2461_v35 = vpack.c.bf16 %v317_v12, %v305_v27  ;;  %v2469_v23 = vpack.c.bf16 %v3024_v45, %v3033_v54 }
  0xab   :  { %2484 = vmatprep.subr.bf16.mxu0 %v2483_v31  ;;  %237 = vmatprep.mubr.f32.mxu1 %v2830_v22  ;;  %v2459_v38 = vpack.c.bf16 %v311_v14, %v299_v32  ;;  %v2433_v31 = vld [vmem:[%s3442_s3 + $0x30] sm:$0xff] }
  0xac   :  { %598 = vmatprep.mubr.f32.mxu0 %v2830_v22 }
  0xad   :  { %243 = vmatmul.mubr.f32.gmra.mrb[2].mxu1 %v242_v20  ;;  %2460 = vmatprep.subr.bf16.mxu1 %v2459_v38 }
  0xae   :  { %602 = vmatmul.mubr.f32.gmra.mrb[2].mxu0 %v240_v24  ;;  %2462 = vmatpush1.bf16.msra.mxu1 %v2461_v35 }
  0xaf   :  { %2486 = vmatpush1.bf16.msra.mxu0 %v2485_v26  ;;  %2464 = vmatprep.subr.bf16.mxu1 %v2463_v7  ;;  %v889_v7 = vsel %vm141_vm0, %v2433_v31, 0 }
  0xb0   :  { %2488 = vmatprep.subr.bf16.mxu0 %v3000_v21  ;;  %248 = vmatprep.mubr.f32.mxu1 %v2830_v22  ;;  %v2467_v21 = vpack.c.bf16 %v3029_v49, %v3039_v58 }
  0xb1   :  { %607 = vmatprep.mubr.f32.mxu0 %v2830_v22  ;;  %254 = vmatmul.mubr.f32.gmra.mrb[4].mxu1 %v253_v36 }
  0xb2   :  { %611 = vmatmul.mubr.f32.gmra.mrb[4].mxu0 %v251_v1  ;;  %259 = vmatprep.mubr.f32.mxu1 %v2830_v22 }
  0xb3   :  { %616 = vmatprep.mubr.f32.mxu0 %v2830_v22 }
  0xb5   :  { %265 = vmatmul.mubr.f32.gmra.mrb[6].mxu1 %v264_v39 }
  0xb6   :  { %620 = vmatmul.mubr.f32.gmra.mrb[6].mxu0 %v262_v34  ;;  %375 = vmatprep.mubr.f32.mxu1 %v2830_v22 }
  0xb7   :  { %714 = vmatprep.mubr.f32.mxu0 %v2830_v22 }
  0xb9   :  { %377 = vmatmul.mubr.f32.vlgmr.msra.gmra.mrb[0].mxu1 %v2967_v52 }
  0xba   :  { %2466 = vmatpush1.bf16.msra.mxu1 %v2465_v9  ;;  %716 = vmatmul.mubr.f32.vlgmr.msra.gmra.mrb[0].mxu0 %v2967_v52  ;;  %v2434_v9 = vld [vmem:[%s3442_s3 + $0x38] sm:$0xff] }
  0xbb   :  { %2490 = vmatpush1.bf16.msra.mxu0 %v2986_v16  ;;  %2468 = vmatprep.subr.bf16.mxu1 %v2467_v21 }
  0xbc   :  { %2492 = vmatprep.subr.bf16.mxu0 %v3037_v57  ;;  %382 = vmatprep.mubr.f32.mxu1 %v2830_v22  ;;  %v2432_v57 = vld [vmem:[%s3442_s3 + $0x28] sm:$0xff] }
  0xbd   :  { %721 = vmatprep.mubr.f32.mxu0 %v2830_v22  ;;  %384 = vmatmul.mubr.f32.gmra.mrb[2].mxu1 %v2973_v2  ;;  %v886_v3 = vsel %vm141_vm0, %v2432_v57, 0 }
  0xbe   :  { %2470 = vmatpush1.bf16.msra.mxu1 %v2469_v23  ;;  %723 = vmatmul.mubr.f32.gmra.mrb[2].mxu0 %v2973_v2  ;;  %v3128_v15 = vand.u32 4294901760, %v886_v3 }
  0xbf   :  { %2494 = vmatpush1.bf16.msra.mxu0 %v3031_v53  ;;  %389 = vmatprep.mubr.f32.mxu1 %v2830_v22 }
  0xc0   :  { %728 = vmatprep.mubr.f32.mxu0 %v2830_v22  ;;  %v3139_v26 = vsub.f32 %v886_v3, %v3128_v15 }
  0xc1   :  { %391 = vmatmul.mubr.f32.gmra.mrb[4].mxu1 %v3005_v25 }
  0xc2   :  { %730 = vmatmul.mubr.f32.gmra.mrb[4].mxu0 %v3005_v25  ;;  %396 = vmatprep.mubr.f32.mxu1 %v2830_v22 }
  0xc3   :  { %735 = vmatprep.mubr.f32.mxu0 %v2830_v22 }
  0xc5   :  { %398 = vmatmul.mubr.f32.gmra.mrb[6].mxu1 %v3027_v47 }
  0xc6   :  { %737 = vmatmul.mubr.f32.gmra.mrb[6].mxu0 %v3027_v47  ;;  %484 = vmatprep.mubr.f32.mxu1 %v2830_v22 }
  0xc7   :  { %815 = vmatprep.mubr.f32.mxu0 %v2830_v22 }
  0xc9   :  { %487 = vmatmul.mubr.f32.vlgmr.msra.gmra.mrb[0].mxu1 %v2971_v0 }
  0xca   :  { %817 = vmatmul.mubr.f32.vlgmr.msra.gmra.mrb[0].mxu0 %v2967_v52  ;;  %492 = vmatprep.mubr.f32.mxu1 %v2830_v22  ;;  %v124_v52 = vpop.permute.xlu0 %123 }
  0xcb   :  { %822 = vmatprep.mubr.f32.mxu0 %v2830_v22 }
  0xcd   :  { %495 = vmatmul.mubr.f32.gmra.mrb[2].mxu1 %v2982_v10 }
  0xce   :  { %824 = vmatmul.mubr.f32.gmra.mrb[2].mxu0 %v2973_v2  ;;  %500 = vmatprep.mubr.f32.mxu1 %v2830_v22  ;;  %v134_v50 = vpop.permute.xlu0 %133 }
  0xcf   :  { %829 = vmatprep.mubr.f32.mxu0 %v2830_v22 }
  0xd1   :  { %503 = vmatmul.mubr.f32.gmra.mrb[4].mxu1 %v3022_v42  ;;  %v2431_v42 = vld [vmem:[%s3442_s3 + $0x20] sm:$0xff] }
  0xd2   :  { %831 = vmatmul.mubr.f32.gmra.mrb[4].mxu0 %v3005_v25  ;;  %508 = vmatprep.mubr.f32.mxu1 %v2830_v22  ;;  %v129_v25 = vpop.permute.xlu1 %128  ;;  %v883_v49 = vsel %vm141_vm0, %v2431_v42, 0 }
  0xd3   :  { %836 = vmatprep.mubr.f32.mxu0 %v2830_v22  ;;  %v3122_v60 = vand.u32 4294901760, %v883_v49 }
  0xd5   :  { %511 = vmatmul.mubr.f32.gmra.mrb[6].mxu1 %v3050_v6  ;;  %v3126_v12 = vsub.f32 %v883_v49, %v3122_v60 }
  0xd6   :  { %838 = vmatmul.mubr.f32.gmra.mrb[6].mxu0 %v3027_v47  ;;  %966 = vmatprep.mubr.f32.mxu1 %v2830_v22  ;;  %v139_v62 = vpop.permute.xlu1 %138 }
  0xd7   :  { %1706 = vmatprep.mubr.f32.mxu0 %v2830_v22  ;;  %v969_v34 = vand.u32 4294901760, %v3126_v12 }
 0x19c   :  { %v488_v0 = vpop.f32.mrb[0].mxu1 }
 0x19d   :  { %v2591_v2 = vadd.f32 %v488_v0, %v124_v52  ;;  %v818_v10 = vpop.f32.mrb[0].mxu0  ;;  %v490_v16 = vpop.f32.mrb[1].mxu1 }
 0x19e   :  { %v2593_v17 = vadd.f32 %v490_v16, %v124_v52  ;;  %v820_v18 = vpop.f32.mrb[1].mxu0 }
 0x19f   :  { %v2592_v24 = vadd.f32 %v2591_v2, %v818_v10  ;;  %v970_v2 = vsub.f32 %v3126_v12, %v969_v34  ;;  %v3154_v10 = vand.u32 4294901760, %v889_v7 }
 0x1a0   :  { %v2594_v40 = vadd.f32 %v2593_v17, %v820_v18  ;;  %v496_v41 = vpop.f32.mrb[2].mxu1 }
 0x1a1   :  { %2757 = vtanh.f32 %v2592_v24  ;;  %v2595_v43 = vadd.f32 %v496_v41, %v129_v25  ;;  %v825_v44 = vpop.f32.mrb[2].mxu0  ;;  %v498_v45 = vpop.f32.mrb[3].mxu1  ;;  %v980_v24 = vand.u32 4294901760, %v3139_v26 }
 0x1a2   :  { %2759 = vtanh.f32 %v2594_v40  ;;  %v2597_v46 = vadd.f32 %v498_v45, %v129_v25  ;;  %v827_v47 = vpop.f32.mrb[3].mxu0  ;;  %v892_v25 = vsel %vm141_vm0, %v2434_v9, 0 }
 0x1a3   :  { %v2596_v48 = vadd.f32 %v2595_v43, %v825_v44  ;;  %v3183_v57 = vand.u32 4294901760, %v892_v25  ;;  %v981_v31 = vsub.f32 %v3139_v26, %v980_v24 }
 0x1a4   :  { %v2598_v51 = vadd.f32 %v2597_v46, %v827_v47  ;;  %v504_v53 = vpop.f32.mrb[4].mxu1 }
 0x1a5   :  { %2761 = vtanh.f32 %v2596_v48  ;;  %v2599_v54 = vadd.f32 %v504_v53, %v134_v50  ;;  %v832_v55 = vpop.f32.mrb[4].mxu0  ;;  %v506_v56 = vpop.f32.mrb[5].mxu1 }
 0x1a6   :  { %2763 = vtanh.f32 %v2598_v51  ;;  %v2601_v58 = vadd.f32 %v506_v56, %v134_v50  ;;  %v834_v59 = vpop.f32.mrb[5].mxu0  ;;  %v3176_v51 = vsub.f32 %v889_v7, %v3154_v10 }
 0x1a7   :  { %v2600_v61 = vadd.f32 %v2599_v54, %v832_v55 }
 0x1a8   :  { %v2602_v63 = vadd.f32 %v2601_v58, %v834_v59  ;;  %v512_v1 = vpop.f32.mrb[6].mxu1 }
 0x1a9   :  { %2765 = vtanh.f32 %v2600_v61  ;;  %v2603_v4 = vadd.f32 %v512_v1, %v139_v62  ;;  %v839_v5 = vpop.f32.mrb[6].mxu0  ;;  %v514_v6 = vpop.f32.mrb[7].mxu1 }
 0x1aa   :  { %2767 = vtanh.f32 %v2602_v63  ;;  %v2605_v8 = vadd.f32 %v514_v6, %v139_v62  ;;  %v841_v11 = vpop.f32.mrb[7].mxu0 }
 0x1ab   :  { %v2758_v13 = vpop.eup %2757  ;;  %v2604_v14 = vadd.f32 %v2603_v4, %v839_v5 }
 0x1ac   :  { %v2760_v19 = vpop.eup %2759  ;;  %v2606_v20 = vadd.f32 %v2605_v8, %v841_v11  ;;  %v896_v27 = vand.u32 4294901760, %v2758_v13 }
 0x1ad   :  { %2769 = vtanh.f32 %v2604_v14  ;;  %v894_v32 = vand.u32 4294901760, %v2760_v19 }
 0x1ae   :  { %2771 = vtanh.f32 %v2606_v20  ;;  %v3133_v33 = vsub.f32 %v2758_v13, %v896_v27  ;;  %v971_v13 = vand.u32 4294901760, %v970_v2 }
 0x1af   :  { %v2762_v35 = vpop.eup %2761  ;;  %v3136_v38 = vsub.f32 %v2760_v19, %v894_v32 }
 0x1b0   :  { %v2764_v36 = vpop.eup %2763  ;;  %v900_v37 = vand.u32 4294901760, %v2762_v35  ;;  %v1019_v39 = vand.u32 4294901760, %v3133_v33 }
 0x1b1   :  { %v898_v21 = vand.u32 4294901760, %v2764_v36  ;;  %v1013_v23 = vand.u32 4294901760, %v3136_v38 }
 0x1b2   :  { %v3147_v52 = vpack.c.bf16 %v900_v37, %v896_v27  ;;  %v3149_v0 = vsub.f32 %v2762_v35, %v900_v37  ;;  %v1020_v42 = vsub.f32 %v3133_v33, %v1019_v39 }
 0x1b3   :  { %v2766_v16 = vpop.eup %2765  ;;  %v3156_v17 = vpack.c.bf16 %v898_v21, %v894_v32  ;;  %v3158_v18 = vsub.f32 %v2764_v36, %v898_v21  ;;  %v1014_v46 = vsub.f32 %v3136_v38, %v1013_v23 }
 0x1b4   :  { %v2768_v40 = vpop.eup %2767  ;;  %v904_v41 = vand.u32 4294901760, %v2766_v16  ;;  %v1031_v43 = vand.u32 4294901760, %v3149_v0  ;;  %v2513_v44 = vpack.c.bf16 %v3149_v0, %v3133_v33  ;;  %v1021_v62 = vand.u32 4294901760, %v1020_v42 }
 0x1b5   :  { %2496 = vmatprep.subr.bf16.mxu1 %v3156_v17  ;;  %v902_v45 = vand.u32 4294901760, %v2768_v40  ;;  %v1025_v47 = vand.u32 4294901760, %v3158_v18  ;;  %v2511_v48 = vpack.c.bf16 %v3158_v18, %v3136_v38  ;;  %v1015_v4 = vand.u32 4294901760, %v1014_v46 }
 0x1b6   :  { %2498 = vmatpush1.bf16.msra.mxu1 %v3147_v52  ;;  %v3172_v49 = vsub.f32 %v2766_v16, %v904_v41  ;;  %v1032_v50 = vsub.f32 %v3149_v0, %v1031_v43  ;;  %v3178_v53 = vpack.c.bf16 %v1031_v43, %v1019_v39  ;;  %v991_v38 = vand.u32 4294901760, %v3176_v51  ;;  %v870_v0 = vpop.permute.xlu1 %869 }
 0x1b7   :  { %v2770_v54 = vpop.eup %2769  ;;  %v3180_v55 = vsub.f32 %v2768_v40, %v902_v45  ;;  %v1026_v56 = vsub.f32 %v3158_v18, %v1025_v47  ;;  %v3185_v58 = vpack.c.bf16 %v1025_v47, %v1013_v23  ;;  %v3202_v39 = vsub.f32 %v892_v25, %v3183_v57 }
 0x1b8   :  { %v2772_v59 = vpop.eup %2771  ;;  %v908_v61 = vand.u32 4294901760, %v2770_v54  ;;  %v1033_v63 = vand.u32 4294901760, %v1032_v50  ;;  %v1043_v1 = vand.u32 4294901760, %v3172_v49  ;;  %v982_v18 = vand.u32 4294901760, %v981_v31 }
 0x1b9   :  { %v906_v3 = vand.u32 4294901760, %v2772_v59  ;;  %v1027_v5 = vand.u32 4294901760, %v1026_v56  ;;  %v1037_v6 = vand.u32 4294901760, %v3180_v55  ;;  %v992_v25 = vsub.f32 %v3176_v51, %v991_v38 }
 0x1ba   :  { %v3189_v8 = vpack.c.bf16 %v908_v61, %v904_v41  ;;  %v1054_v11 = vsub.f32 %v2770_v54, %v908_v61  ;;  %v2505_v14 = vpack.c.bf16 %v1033_v63, %v1021_v62  ;;  %v1044_v32 = vsub.f32 %v3172_v49, %v1043_v1  ;;  %v880_v61 = vpop.permute.xlu1 %879 }
 0x1bb   :  { %v3191_v19 = vpack.c.bf16 %v906_v3, %v902_v45  ;;  %v1048_v20 = vsub.f32 %v2772_v59, %v906_v3  ;;  %v2503_v27 = vpack.c.bf16 %v1027_v5, %v1015_v4  ;;  %v1038_v36 = vsub.f32 %v3180_v55, %v1037_v6 }
 0x1bc   :  { %v1055_v35 = vand.u32 4294901760, %v1054_v11  ;;  %v2517_v7 = vpack.c.bf16 %v1054_v11, %v3172_v49  ;;  %v1045_v40 = vand.u32 4294901760, %v1044_v32  ;;  %v1002_v45 = vand.u32 4294901760, %v3202_v39 }
 0x1bd   :  { %2500 = vmatprep.subr.bf16.mxu1 %v3191_v19  ;;  %v1049_v37 = vand.u32 4294901760, %v1048_v20  ;;  %v2515_v9 = vpack.c.bf16 %v1048_v20, %v3180_v55  ;;  %v1039_v42 = vand.u32 4294901760, %v1038_v36  ;;  %v993_v49 = vand.u32 4294901760, %v992_v25 }
 0x1be   :  { %2502 = vmatpush1.bf16.msra.mxu1 %v3189_v8  ;;  %v1056_v21 = vsub.f32 %v1054_v11, %v1055_v35  ;;  %v2533_v23 = vpack.c.bf16 %v1055_v35, %v1043_v1  ;;  %v1003_v50 = vsub.f32 %v3202_v39, %v1002_v45 }
 0x1bf   :  { %2504 = vmatprep.subr.bf16.mxu1 %v2503_v27  ;;  %v1050_v2 = vsub.f32 %v1048_v20, %v1049_v37  ;;  %v2531_v16 = vpack.c.bf16 %v1049_v37, %v1037_v6  ;;  %v2442_v37 = vld [vmem:[%s3442_s3 + $0x58] sm:$0xff] }
 0x1c0   :  { %v1057_v41 = vand.u32 4294901760, %v1056_v21  ;;  %v1004_v54 = vand.u32 4294901760, %v1003_v50 }
 0x1c1   :  { %972 = vmatmul.mubr.f32.vlgmr.msra.gmra.mrb[8].mxu1 %v971_v13  ;;  %v1051_v43 = vand.u32 4294901760, %v1050_v2  ;;  %v2441_v13 = vld [vmem:[%s3442_s3 + $0x50] sm:$0xff] }
 0x1c2   :  { %2506 = vmatpush1.bf16.msra.mxu1 %v2505_v14  ;;  %977 = vmatprep.mubr.f32.mxu1 %v2830_v22  ;;  %v2509_v46 = vpack.c.bf16 %v1057_v41, %v1045_v40  ;;  %v1629_v35 = vsel %vm141_vm0, %v2441_v13, 0 }
 0x1c3   :  { %v2507_v47 = vpack.c.bf16 %v1051_v43, %v1039_v42  ;;  %v1632_v43 = vsel %vm141_vm0, %v2442_v37, 0 }
 0x1c5   :  { %983 = vmatmul.mubr.f32.gmra.mrb[10].mxu1 %v982_v18  ;;  %2508 = vmatprep.subr.bf16.mxu1 %v2507_v47 }
 0x1c6   :  { %2510 = vmatpush1.bf16.msra.mxu1 %v2509_v46  ;;  %988 = vmatprep.mubr.f32.mxu1 %v2830_v22 }
 0x1c7   :  { %2512 = vmatprep.subr.bf16.mxu1 %v2511_v48  ;;  %v2440_v48 = vld [vmem:[%s3442_s3 + $0x48] sm:$0xff] }
 0x1c8   :  { %v1626_v59 = vsel %vm141_vm0, %v2440_v48, 0 }
 0x1c9   :  { %994 = vmatmul.mubr.f32.gmra.mrb[12].mxu1 %v993_v49  ;;  %v3282_v5 = vand.u32 4294901760, %v1626_v59 }
 0x1ca   :  { %999 = vmatprep.mubr.f32.mxu1 %v2830_v22 }
 0x1cb   :  { %v3293_v32 = vsub.f32 %v1626_v59, %v3282_v5 }
 0x1cd   :  { %1005 = vmatmul.mubr.f32.gmra.mrb[14].mxu1 %v1004_v54  ;;  %v1720_v42 = vand.u32 4294901760, %v3293_v32 }
 0x1ce   :  { %1115 = vmatprep.mubr.f32.mxu1 %v2830_v22 }
 0x1cf   :  { %v1721_v13 = vsub.f32 %v3293_v32, %v1720_v42 }
 0x1d1   :  { %1117 = vmatmul.mubr.f32.vlgmr.msra.gmra.mrb[8].mxu1 %v3122_v60 }
 0x1d2   :  { %2514 = vmatpush1.bf16.msra.mxu1 %v2513_v44  ;;  %1122 = vmatprep.mubr.f32.mxu1 %v2830_v22 }
 0x1d3   :  { %2516 = vmatprep.subr.bf16.mxu1 %v2515_v9 }
 0x1d5   :  { %1124 = vmatmul.mubr.f32.gmra.mrb[10].mxu1 %v3128_v15 }
 0x1d6   :  { %2518 = vmatpush1.bf16.msra.mxu1 %v2517_v7  ;;  %1129 = vmatprep.mubr.f32.mxu1 %v2830_v22 }
 0x1d7   :  { %2520 = vmatprep.subr.bf16.mxu1 %v3156_v17 }
 0x1d9   :  { %1131 = vmatmul.mubr.f32.gmra.mrb[12].mxu1 %v3154_v10 }
 0x1da   :  { %1136 = vmatprep.mubr.f32.mxu1 %v2830_v22 }
 0x1dd   :  { %1138 = vmatmul.mubr.f32.gmra.mrb[14].mxu1 %v3183_v57 }
 0x1de   :  { %1224 = vmatprep.mubr.f32.mxu1 %v2830_v22 }
 0x1e1   :  { %1227 = vmatmul.mubr.f32.vlgmr.msra.gmra.mrb[8].mxu1 %v3126_v12  ;;  %v865_v12 = vpop.permute.xlu0 %864 }
 0x1e2   :  { %2522 = vmatpush1.bf16.msra.mxu1 %v3147_v52  ;;  %1232 = vmatprep.mubr.f32.mxu1 %v2830_v22 }
 0x1e3   :  { %2524 = vmatprep.subr.bf16.mxu1 %v3191_v19 }
 0x1e5   :  { %1235 = vmatmul.mubr.f32.gmra.mrb[10].mxu1 %v3139_v26 }
 0x1e6   :  { %2526 = vmatpush1.bf16.msra.mxu1 %v3189_v8  ;;  %1240 = vmatprep.mubr.f32.mxu1 %v2830_v22 }
 0x1e7   :  { %2528 = vmatprep.subr.bf16.mxu1 %v3185_v58 }
 0x1e9   :  { %1243 = vmatmul.mubr.f32.gmra.mrb[12].mxu1 %v3176_v51  ;;  %v875_v51 = vpop.permute.xlu0 %874 }
 0x1ea   :  { %1248 = vmatprep.mubr.f32.mxu1 %v2830_v22 }
 0x1ed   :  { %1251 = vmatmul.mubr.f32.gmra.mrb[14].mxu1 %v3202_v39 }
 0x1ee   :  { %1329 = vmatprep.mubr.f32.mxu1 %v2830_v22 }
 0x1f1   :  { %1333 = vmatmul.mubr.f32.vlgmr.msra.gmra.mrb[8].mxu1 %v969_v34 }
 0x1f2   :  { %2530 = vmatpush1.bf16.msra.mxu1 %v3178_v53  ;;  %1338 = vmatprep.mubr.f32.mxu1 %v2830_v22 }
 0x1f3   :  { %2532 = vmatprep.subr.bf16.mxu1 %v2531_v16  ;;  %v3308_v16 = vand.u32 4294901760, %v1629_v35 }
 0x1f5   :  { %1342 = vmatmul.mubr.f32.gmra.mrb[10].mxu1 %v980_v24 }
 0x1f6   :  { %2534 = vmatpush1.bf16.msra.mxu1 %v2533_v23  ;;  %1347 = vmatprep.mubr.f32.mxu1 %v2830_v22 }
 0x1f7   :  { %2536 = vmatprep.subr.bf16.mxu1 %v3156_v17 }
 0x1f9   :  { %1351 = vmatmul.mubr.f32.gmra.mrb[12].mxu1 %v991_v38 }
 0x1fa   :  { %1356 = vmatprep.mubr.f32.mxu1 %v2830_v22 }
 0x1fd   :  { %1360 = vmatmul.mubr.f32.gmra.mrb[14].mxu1 %v1002_v45 }
 0x1fe   :  { %1454 = vmatprep.mubr.f32.mxu1 %v2830_v22 }
 0x201   :  { %1456 = vmatmul.mubr.f32.vlgmr.msra.gmra.mrb[8].mxu1 %v3122_v60 }
 0x202   :  { %2538 = vmatpush1.bf16.msra.mxu1 %v3147_v52  ;;  %1461 = vmatprep.mubr.f32.mxu1 %v2830_v22 }
 0x203   :  { %2540 = vmatprep.subr.bf16.mxu1 %v3191_v19 }
 0x205   :  { %1463 = vmatmul.mubr.f32.gmra.mrb[10].mxu1 %v3128_v15 }
 0x206   :  { %2542 = vmatpush1.bf16.msra.mxu1 %v3189_v8  ;;  %1468 = vmatprep.mubr.f32.mxu1 %v2830_v22 }
 0x209   :  { %1470 = vmatmul.mubr.f32.gmra.mrb[12].mxu1 %v3154_v10 }
 0x20a   :  { %1475 = vmatprep.mubr.f32.mxu1 %v2830_v22 }
 0x20d   :  { %1477 = vmatmul.mubr.f32.gmra.mrb[14].mxu1 %v3183_v57 }
 0x20e   :  { %1555 = vmatprep.mubr.f32.mxu1 %v2830_v22 }
 0x211   :  { %1557 = vmatmul.mubr.f32.vlgmr.msra.gmra.mrb[8].mxu1 %v3122_v60  ;;  %v2439_v60 = vld [vmem:[%s3442_s3 + $0x40] sm:$0xff]  ;;  %s2832_s3 = smov [#allocation3]  }
 0x212   :  { %1562 = vmatprep.mubr.f32.mxu1 %v2830_v22  ;;  %s2423_s21 = sshll.u32 %s2832_s3, 4  ;;  %s2424_s21 = int_to_ptr.vmem [resolvable:$true] %s2423_s21 }
 0x213   :  { %s2805_s4 = scalar_lea.vmem %s2424_s21, 32  ;;  %p2810_p1 = scmp.lt.s32.totalorder %s2424_s21, %s2424_s21 }
 0x214   :  { %p2806_p0 = scmp.ne.s32.totalorder %s2424_s21, %s2805_s4  ;;  %p2811_p2 = scmp.lt.s32.totalorder %s2805_s4, %s2805_s4 }
 0x215   :  { %1564 = vmatmul.mubr.f32.gmra.mrb[10].mxu1 %v3128_v15 }
 0x216   :  { %1569 = vmatprep.mubr.f32.mxu1 %v2830_v22  ;;  %p2812_p3 = por %p2811_p2, %p2810_p1 }
 0x218   :  { %p2813_p4 = pnand %p2812_p3, %p2806_p0 }
 0x219   :  { %1571 = vmatmul.mubr.f32.gmra.mrb[12].mxu1 %v3154_v10  ;;  %v1623_v10 = vsel %vm141_vm0, %v2439_v60, 0 }
 0x21a   :  { %1576 = vmatprep.mubr.f32.mxu1 %v2830_v22  ;;  %v3276_v55 = vand.u32 4294901760, %v1623_v10 }
 0x21c   :  { %v3280_v63 = vsub.f32 %v1623_v10, %v3276_v55 }
 0x21d   :  { %1578 = vmatmul.mubr.f32.gmra.mrb[14].mxu1 %v3183_v57 }
 0x21e   :  { %v1709_v20 = vand.u32 4294901760, %v3280_v63 }
 0x220   :  { %v1710_v2 = vsub.f32 %v3280_v63, %v1709_v20 }
 0x2e4   :  { %v1558_v33 = vpop.f32.mrb[8].mxu1 }
 0x2e5   :  { %v2607_v34 = vadd.f32 %v1558_v33, %v865_v12  ;;  %v1560_v26 = vpop.f32.mrb[9].mxu1 }
 0x2e6   :  { %v2608_v52 = vadd.f32 %v1560_v26, %v865_v12 }
 0x2e7   :  { %2773 = vtanh.f32 %v2607_v34 }
 0x2e8   :  { %2775 = vtanh.f32 %v2608_v52  ;;  %v1565_v15 = vpop.f32.mrb[10].mxu1  ;;  %v3330_v52 = vsub.f32 %v1629_v35, %v3308_v16 }
 0x2e9   :  { %v2609_v17 = vadd.f32 %v1565_v15, %v870_v0  ;;  %v1567_v24 = vpop.f32.mrb[11].mxu1 }
 0x2ea   :  { %v2610_v44 = vadd.f32 %v1567_v24, %v870_v0  ;;  %v3337_v24 = vand.u32 4294901760, %v1632_v43 }
 0x2eb   :  { %2777 = vtanh.f32 %v2609_v17 }
 0x2ec   :  { %2779 = vtanh.f32 %v2610_v44  ;;  %v1572_v53 = vpop.f32.mrb[12].mxu1 }
 0x2ed   :  { %v2611_v56 = vadd.f32 %v1572_v53, %v875_v51  ;;  %v1574_v57 = vpop.f32.mrb[13].mxu1 }
 0x2ee   :  { %v2612_v58 = vadd.f32 %v1574_v57, %v875_v51 }
 0x2ef   :  { %2781 = vtanh.f32 %v2611_v56 }
 0x2f0   :  { %2783 = vtanh.f32 %v2612_v58  ;;  %v1579_v62 = vpop.f32.mrb[14].mxu1 }
 0x2f1   :  { %v2774_v1 = vpop.eup %2773  ;;  %v2613_v3 = vadd.f32 %v1579_v62, %v880_v61  ;;  %v1581_v4 = vpop.f32.mrb[15].mxu1 }
 0x2f2   :  { %v2776_v6 = vpop.eup %2775  ;;  %v2614_v8 = vadd.f32 %v1581_v4, %v880_v61  ;;  %v1636_v11 = vand.u32 4294901760, %v2774_v1 }
 0x2f3   :  { %2785 = vtanh.f32 %v2613_v3  ;;  %v1634_v14 = vand.u32 4294901760, %v2776_v6  ;;  %v1711_v3 = vand.u32 4294901760, %v1710_v2 }
 0x2f4   :  { %2787 = vtanh.f32 %v2614_v8  ;;  %v3287_v19 = vsub.f32 %v2774_v1, %v1636_v11 }
 0x2f5   :  { %v2778_v27 = vpop.eup %2777  ;;  %v3290_v31 = vsub.f32 %v2776_v6, %v1634_v14 }
 0x2f6   :  { %v2780_v38 = vpop.eup %2779  ;;  %v1640_v7 = vand.u32 4294901760, %v2778_v27  ;;  %v1759_v36 = vand.u32 4294901760, %v3287_v19 }
 0x2f7   :  { %v1638_v39 = vand.u32 4294901760, %v2780_v38  ;;  %v1753_v9 = vand.u32 4294901760, %v3290_v31 }
 0x2f8   :  { %v3301_v21 = vpack.c.bf16 %v1640_v7, %v1636_v11  ;;  %v3303_v23 = vsub.f32 %v2778_v27, %v1640_v7  ;;  %v1760_v46 = vsub.f32 %v3287_v19, %v1759_v36 }
 0x2f9   :  { %v2782_v18 = vpop.eup %2781  ;;  %v3310_v40 = vpack.c.bf16 %v1638_v39, %v1634_v14  ;;  %v3312_v41 = vsub.f32 %v2780_v38, %v1638_v39  ;;  %v1754_v54 = vsub.f32 %v3290_v31, %v1753_v9 }
 0x2fa   :  { %v2784_v25 = vpop.eup %2783  ;;  %v1644_v45 = vand.u32 4294901760, %v2782_v18  ;;  %v1771_v47 = vand.u32 4294901760, %v3303_v23  ;;  %v2561_v49 = vpack.c.bf16 %v3303_v23, %v3287_v19  ;;  %v1761_v51 = vand.u32 4294901760, %v1760_v46 }
 0x2fb   :  { %2544 = vmatprep.subr.bf16.mxu0 %v3310_v40  ;;  %v1642_v50 = vand.u32 4294901760, %v2784_v25  ;;  %v1765_v12 = vand.u32 4294901760, %v3312_v41  ;;  %v2559_v33 = vpack.c.bf16 %v3312_v41, %v3290_v31  ;;  %v1755_v58 = vand.u32 4294901760, %v1754_v54 }
 0x2fc   :  { %2546 = vmatpush1.bf16.msra.mxu0 %v3301_v21  ;;  %v3326_v34 = vsub.f32 %v2782_v18, %v1644_v45  ;;  %v1772_v26 = vsub.f32 %v3303_v23, %v1771_v47  ;;  %v3332_v60 = vpack.c.bf16 %v1771_v47, %v1759_v36  ;;  %v1731_v31 = vand.u32 4294901760, %v3330_v52  ;;  %v1610_v23 = vpop.permute.xlu1 %1609 }
 0x2fd   :  { %v2786_v0 = vpop.eup %2785  ;;  %v3334_v15 = vsub.f32 %v2784_v25, %v1642_v50  ;;  %v1766_v17 = vsub.f32 %v3312_v41, %v1765_v12  ;;  %v3339_v10 = vpack.c.bf16 %v1765_v12, %v1753_v9  ;;  %v3356_v36 = vsub.f32 %v1632_v43, %v3337_v24 }
 0x2fe   :  { %v2788_v44 = vpop.eup %2787  ;;  %v1648_v48 = vand.u32 4294901760, %v2786_v0  ;;  %v1773_v53 = vand.u32 4294901760, %v1772_v26  ;;  %v1783_v56 = vand.u32 4294901760, %v3326_v34  ;;  %v1722_v41 = vand.u32 4294901760, %v1721_v13 }
 0x2ff   :  { %v1646_v57 = vand.u32 4294901760, %v2788_v44  ;;  %v1767_v59 = vand.u32 4294901760, %v1766_v17  ;;  %v1777_v61 = vand.u32 4294901760, %v3334_v15  ;;  %v1732_v43 = vsub.f32 %v3330_v52, %v1731_v31 }
 0x300   :  { %v3343_v62 = vpack.c.bf16 %v1648_v48, %v1644_v45  ;;  %v1794_v1 = vsub.f32 %v2786_v0, %v1648_v48  ;;  %v2553_v4 = vpack.c.bf16 %v1773_v53, %v1761_v51  ;;  %v1784_v14 = vsub.f32 %v3326_v34, %v1783_v56 }
 0x301   :  { %v3345_v6 = vpack.c.bf16 %v1646_v57, %v1642_v50  ;;  %v1788_v8 = vsub.f32 %v2788_v44, %v1646_v57  ;;  %v2551_v11 = vpack.c.bf16 %v1767_v59, %v1755_v58  ;;  %v1778_v38 = vsub.f32 %v3334_v15, %v1777_v61 }
 0x302   :  { %v1795_v27 = vand.u32 4294901760, %v1794_v1  ;;  %v2565_v35 = vpack.c.bf16 %v1794_v1, %v3326_v34  ;;  %v1785_v25 = vand.u32 4294901760, %v1784_v14  ;;  %v1742_v50 = vand.u32 4294901760, %v3356_v36 }
 0x303   :  { %2548 = vmatprep.subr.bf16.mxu0 %v3345_v6  ;;  %v1789_v7 = vand.u32 4294901760, %v1788_v8  ;;  %v2563_v37 = vpack.c.bf16 %v1788_v8, %v3334_v15  ;;  %v1779_v46 = vand.u32 4294901760, %v1778_v38  ;;  %v1733_v34 = vand.u32 4294901760, %v1732_v43 }
 0x304   :  { %2550 = vmatpush1.bf16.msra.mxu0 %v3343_v62  ;;  %v1796_v39 = vsub.f32 %v1794_v1, %v1795_v27  ;;  %v2581_v9 = vpack.c.bf16 %v1795_v27, %v1783_v56  ;;  %v1743_v26 = vsub.f32 %v3356_v36, %v1742_v50 }
 0x305   :  { %2552 = vmatprep.subr.bf16.mxu0 %v2551_v11  ;;  %v1790_v2 = vsub.f32 %v1788_v8, %v1789_v7  ;;  %v2579_v18 = vpack.c.bf16 %v1789_v7, %v1777_v61 }
 0x306   :  { %v1797_v45 = vand.u32 4294901760, %v1796_v39  ;;  %v1744_v0 = vand.u32 4294901760, %v1743_v26 }
 0x307   :  { %1712 = vmatmul.mubr.f32.vlgmr.msra.gmra.mrb[8].mxu0 %v1711_v3  ;;  %v1791_v47 = vand.u32 4294901760, %v1790_v2 }
 0x308   :  { %2554 = vmatpush1.bf16.msra.mxu0 %v2553_v4  ;;  %1717 = vmatprep.mubr.f32.mxu0 %v2830_v22  ;;  %v2557_v54 = vpack.c.bf16 %v1797_v45, %v1785_v25 }
 0x309   :  { %v2555_v12 = vpack.c.bf16 %v1791_v47, %v1779_v46  ;;  %v2831_v46 = vmov 1966171168  }
 0x30a   :  { %v2398_v47 = vunpack.c.l.s4 %v2831_v46 }
 0x30b   :  { %1723 = vmatmul.mubr.f32.gmra.mrb[10].mxu0 %v1722_v41  ;;  %2556 = vmatprep.subr.bf16.mxu0 %v2555_v12 }
 0x30c   :  { %2558 = vmatpush1.bf16.msra.mxu0 %v2557_v54  ;;  %1728 = vmatprep.mubr.f32.mxu0 %v2830_v22  ;;  %v2399_v26 = vunpack.c.0.s8 %v2398_v47 }
 0x30d   :  { %2560 = vmatprep.subr.bf16.mxu0 %v2559_v33 }
 0x30f   :  { %1734 = vmatmul.mubr.f32.gmra.mrb[12].mxu0 %v1733_v34 }
 0x310   :  { %1739 = vmatprep.mubr.f32.mxu0 %v2830_v22 }
 0x313   :  { %1745 = vmatmul.mubr.f32.gmra.mrb[14].mxu0 %v1744_v0 }
 0x314   :  { %1855 = vmatprep.mubr.f32.mxu0 %v2830_v22 }
 0x317   :  { %1857 = vmatmul.mubr.f32.vlgmr.msra.gmra.mrb[8].mxu0 %v3276_v55 }
 0x318   :  { %2562 = vmatpush1.bf16.msra.mxu0 %v2561_v49  ;;  %1862 = vmatprep.mubr.f32.mxu0 %v2830_v22 }
 0x319   :  { %2564 = vmatprep.subr.bf16.mxu0 %v2563_v37 }
 0x31b   :  { %1864 = vmatmul.mubr.f32.gmra.mrb[10].mxu0 %v3282_v5 }
 0x31c   :  { %2566 = vmatpush1.bf16.msra.mxu0 %v2565_v35  ;;  %1869 = vmatprep.mubr.f32.mxu0 %v2830_v22 }
 0x31d   :  { %2568 = vmatprep.subr.bf16.mxu0 %v3310_v40 }
 0x31f   :  { %1871 = vmatmul.mubr.f32.gmra.mrb[12].mxu0 %v3308_v16 }
 0x320   :  { %1876 = vmatprep.mubr.f32.mxu0 %v2830_v22 }
 0x323   :  { %1878 = vmatmul.mubr.f32.gmra.mrb[14].mxu0 %v3337_v24 }
 0x324   :  { %1964 = vmatprep.mubr.f32.mxu0 %v2830_v22 }
 0x327   :  { %1967 = vmatmul.mubr.f32.vlgmr.msra.gmra.mrb[8].mxu0 %v3280_v63  ;;  %v1605_v63 = vpop.permute.xlu0 %1604 }
 0x328   :  { %2570 = vmatpush1.bf16.msra.mxu0 %v3301_v21  ;;  %1972 = vmatprep.mubr.f32.mxu0 %v2830_v22 }
 0x329   :  { %2572 = vmatprep.subr.bf16.mxu0 %v3345_v6 }
 0x32b   :  { %1975 = vmatmul.mubr.f32.gmra.mrb[10].mxu0 %v3293_v32  ;;  %v1615_v49 = vpop.permute.xlu0 %1614 }
 0x32c   :  { %2574 = vmatpush1.bf16.msra.mxu0 %v3343_v62  ;;  %1980 = vmatprep.mubr.f32.mxu0 %v2830_v22 }
 0x32d   :  { %2576 = vmatprep.subr.bf16.mxu0 %v3339_v10 }
 0x32f   :  { %1983 = vmatmul.mubr.f32.gmra.mrb[12].mxu0 %v3330_v52  ;;  %v2339_v48 = vpop.permute.xlu0 %2338 }
 0x330   :  { %1988 = vmatprep.mubr.f32.mxu0 %v2830_v22 }
 0x333   :  { %1991 = vmatmul.mubr.f32.gmra.mrb[14].mxu0 %v3356_v36  ;;  %v2349_v4 = vpop.permute.xlu0 %2348 }
 0x334   :  { %2069 = vmatprep.mubr.f32.mxu0 %v2830_v22 }
 0x337   :  { %2073 = vmatmul.mubr.f32.vlgmr.msra.gmra.mrb[8].mxu0 %v1709_v20 }
 0x338   :  { %2578 = vmatpush1.bf16.msra.mxu0 %v3332_v60  ;;  %2078 = vmatprep.mubr.f32.mxu0 %v2830_v22  ;;  %v1620_v60 = vpop.permute.xlu1 %1619 }
 0x339   :  { %2580 = vmatprep.subr.bf16.mxu0 %v2579_v18 }
 0x33b   :  { %2082 = vmatmul.mubr.f32.gmra.mrb[10].mxu0 %v1720_v42 }
 0x33c   :  { %2582 = vmatpush1.bf16.msra.mxu0 %v2581_v9  ;;  %2087 = vmatprep.mubr.f32.mxu0 %v2830_v22  ;;  %v2344_v56 = vpop.permute.xlu1 %2343 }
 0x33d   :  { %2584 = vmatprep.subr.bf16.mxu0 %v3310_v40 }
 0x33f   :  { %2091 = vmatmul.mubr.f32.gmra.mrb[12].mxu0 %v1731_v31 }
 0x340   :  { %2096 = vmatprep.mubr.f32.mxu0 %v2830_v22  ;;  %v2354_v31 = vpop.permute.xlu1 %2353 }
 0x343   :  { %2100 = vmatmul.mubr.f32.gmra.mrb[14].mxu0 %v1742_v50  ;;  %v2386_v50 = vpop.permute.xlu0 %2385 }
 0x344   :  { %2194 = vmatprep.mubr.f32.mxu0 %v2830_v22  ;;  %v2391_v0 = vrot.slane %v2386_v50, %v57_v30 }
 0x347   :  { %2196 = vmatmul.mubr.f32.vlgmr.msra.gmra.mrb[8].mxu0 %v3276_v55 }
 0x348   :  { %2586 = vmatpush1.bf16.msra.mxu0 %v3301_v21  ;;  %2201 = vmatprep.mubr.f32.mxu0 %v2830_v22 }
 0x349   :  { %2588 = vmatprep.subr.bf16.mxu0 %v3345_v6 }
 0x34b   :  { %2203 = vmatmul.mubr.f32.gmra.mrb[10].mxu0 %v3282_v5 }
 0x34c   :  { %2590 = vmatpush1.bf16.msra.mxu0 %v3343_v62  ;;  %2208 = vmatprep.mubr.f32.mxu0 %v2830_v22 }
 0x34f   :  { %2210 = vmatmul.mubr.f32.gmra.mrb[12].mxu0 %v3308_v16 }
 0x350   :  { %2215 = vmatprep.mubr.f32.mxu0 %v2830_v22 }
 0x353   :  { %2217 = vmatmul.mubr.f32.gmra.mrb[14].mxu0 %v3337_v24 }
 0x354   :  { %2295 = vmatprep.mubr.f32.mxu0 %v2830_v22 }
 0x357   :  { %2297 = vmatmul.mubr.f32.vlgmr.msra.gmra.mrb[8].mxu0 %v3276_v55 }
 0x358   :  { %2302 = vmatprep.mubr.f32.mxu0 %v2830_v22 }
 0x35b   :  { %2304 = vmatmul.mubr.f32.gmra.mrb[10].mxu0 %v3282_v5 }
 0x35c   :  { %2309 = vmatprep.mubr.f32.mxu0 %v2830_v22 }
 0x35f   :  { %2311 = vmatmul.mubr.f32.gmra.mrb[12].mxu0 %v3308_v16 }
 0x360   :  { %2316 = vmatprep.mubr.f32.mxu0 %v2830_v22 }
 0x363   :  { %2318 = vmatmul.mubr.f32.gmra.mrb[14].mxu0 %v3337_v24 }
 0x42a   :  { %v2298_v19 = vpop.f32.mrb[8].mxu0 }
 0x42b   :  { %v2615_v20 = vadd.f32 %v2298_v19, %v1605_v63  ;;  %v2300_v32 = vpop.f32.mrb[9].mxu0 }
 0x42c   :  { %v2616_v21 = vadd.f32 %v2300_v32, %v1605_v63 }
 0x42d   :  { %2789 = vtanh.f32 %v2615_v20 }
 0x42e   :  { %v2305_v40 = vpop.f32.mrb[10].mxu0  ;;  %2791 = vtanh.f32 %v2616_v21  ;;  %v2402_v21 = vsub.s32 %v2399_v26, %v2951_v29 }
 0x42f   :  { %v2617_v55 = vadd.f32 %v2305_v40, %v1610_v23  ;;  %v2307_v42 = vpop.f32.mrb[11].mxu0 }
 0x430   :  { %v2618_v5 = vadd.f32 %v2307_v42, %v1610_v23 }
 0x431   :  { %2793 = vtanh.f32 %v2617_v55 }
 0x432   :  { %2795 = vtanh.f32 %v2618_v5  ;;  %v2312_v16 = vpop.f32.mrb[12].mxu0 }
 0x433   :  { %v2619_v33 = vadd.f32 %v2312_v16, %v1615_v49  ;;  %v2314_v22 = vpop.f32.mrb[13].mxu0 }
 0x434   :  { %v2620_v52 = vadd.f32 %v2314_v22, %v1615_v49 }
 0x435   :  { %2797 = vtanh.f32 %v2619_v33 }
 0x436   :  { %2799 = vtanh.f32 %v2620_v52  ;;  %v2319_v15 = vpop.f32.mrb[14].mxu0 }
 0x437   :  { %v2621_v17 = vadd.f32 %v2319_v15, %v1620_v60  ;;  %v2321_v24 = vpop.f32.mrb[15].mxu0  ;;  %v2790_v44 = vpop.eup %2789 }
 0x438   :  { %v2622_v10 = vadd.f32 %v2321_v24, %v1620_v60  ;;  %v2792_v51 = vpop.eup %2791  ;;  %v2356_v58 = vmul.f32 %v2790_v44, %v2339_v48 }
 0x439   :  { %2801 = vtanh.f32 %v2621_v17  ;;  %v2357_v61 = vmul.f32 %v2792_v51, %v2339_v48 }
 0x43a   :  { %2803 = vtanh.f32 %v2622_v10 }
 0x43b   :  { %v2794_v53 = vpop.eup %2793 }
 0x43c   :  { %v2796_v57 = vpop.eup %2795  ;;  %v2358_v59 = vmul.f32 %v2794_v53, %v2344_v56 }
 0x43d   :  { %v2359_v62 = vmul.f32 %v2796_v57, %v2344_v56 }
 0x43e   :  { %v2364_v1 = vadd.f32 %v2358_v59, %v2356_v58 }
 0x43f   :  { %v2798_v3 = vpop.eup %2797  ;;  %v2373_v6 = vadd.f32 %v2359_v62, %v2357_v61 }
 0x440   :  { %v2800_v8 = vpop.eup %2799  ;;  %v2360_v11 = vmul.f32 %v2798_v3, %v2349_v4 }
 0x441   :  { %v2361_v13 = vmul.f32 %v2800_v8, %v2349_v4 }
 0x442   :  { %v2365_v14 = vadd.f32 %v2364_v1, %v2360_v11 }
 0x443   :  { %v2802_v27 = vpop.eup %2801  ;;  %v2374_v35 = vadd.f32 %v2373_v6, %v2361_v13 }
 0x444   :  { %v2804_v38 = vpop.eup %2803  ;;  %v2362_v7 = vmul.f32 %v2802_v27, %v2354_v31 }
 0x445   :  { %v2363_v36 = vmul.f32 %v2804_v38, %v2354_v31 }
 0x446   :  { %v2366_v37 = vadd.f32 %v2365_v14, %v2362_v7 }
 0x447   :  { %v2375_v39 = vadd.f32 %v2374_v35, %v2363_v36 }
 0x448   :  { %v2367_v9 = vrot.slane %v2366_v37, 4 }
 0x449   :  { %v2376_v2 = vrot.slane %v2375_v39, 4 }
 0x44a   :  { %v2368_v18 = vadd.f32 %v2367_v9, %v2366_v37 }
 0x44b   :  { %v2377_v41 = vadd.f32 %v2376_v2, %v2375_v39 }
 0x44c   :  { %v2369_v25 = vrot.slane %v2368_v18, 2 }
 0x44d   :  { %v2378_v45 = vrot.slane %v2377_v41, 2 }
 0x44e   :  { %v2370_v43 = vadd.f32 %v2369_v25, %v2368_v18 }
 0x44f   :  { %v2379_v54 = vadd.f32 %v2378_v45, %v2377_v41 }
 0x450   :  { %v2371_v12 = vrot.slane %v2370_v43, 1 }
 0x451   :  { %v2380_v34 = vrot.slane %v2379_v54, 1 }
 0x452   :  { %v2372_v63 = vadd.f32 %v2371_v12, %v2370_v43 }
 0x453   :  { %v2381_v19 = vadd.f32 %v2380_v34, %v2379_v54 }
 0x454   :  { %v2392_v20 = vadd.f32 %v2391_v0, %v2372_v63 }
 0x455   :  { %v2393_v32 = vadd.f32 %v2391_v0, %v2381_v19 }
 0x457   :  { %v2396_v23 = vcombine.low %v2392_v20, %v2393_v32 }
 0x459   :  { %v2403_v40 = vrot.slane %v2396_v23, %v2402_v21 }
 0x45b   :  { %v2410_v55 = vrot.slane %v2403_v40, %v2402_v21 }
 0x45d   :  { %2416 = vst.msk [vmem:[#allocation3] sm:$0x3] %vm2414_vm1, %v2410_v55 }
 0x45e   :  { %2816 = shalt.err (!%p2813_p4)
}
 0x45f   :  { %s2817_s23 = scalar_lea.hbm %s3446_s7, 32 }
 0x460   :  { %p2818_p5 = scmp.ne.s32.totalorder %s3446_s7, %s2817_s23  ;;  %p2821_p6 = scmp.lt.u32.totalorder %s2817_s23, %s3446_s7 }
 0x462   :  { %p2823_p7 = pnand %p2821_p6, %p2818_p5 }
 0x464   :  { %2826 = shalt.err (!%p2823_p7)
}
 0x465   :  { %2426 = dma.vmem_to_hbm [thread:$0]  %s2424_s21, 32, %s3446_s7, [#allocation4]  }
 0x466   :  { %2827 = dma.done.wait [#allocation4], 32  }
 0x467   :  { %2828 = vsyncadd [#allocation4], 4294967264 }
 0x468   :  { %2430 = vsyncpa [#allocation4], 1 }

</bundles_post_ra>
